<compile_context>
chip_gen: v6e
topology: v6e:2x2x1
jax: 0.10.0
libtpu: 0.0.40
codegen_flags: <defaults>
</compile_context>

<pallas_src>
import functools

import jax
import jax.numpy as jnp
from jax import lax
from jax.experimental import pallas as pl
from jax.experimental.pallas import tpu as pltpu


def _st_gcn_kernel(x_ref, Abd_ref, Wg_ref, Wt_ref, B_ref, out_ref, *, V, Kt):
    # x_ref   : (NBC, TV)        batch-folded input (rows = n*C + c, lanes = t*V + v)
    # Abd_ref : (TV, TV)         block-diagonal adjacency (blockdiag of A[t])
    # Wg_ref  : (NBC, NBC)       block-diag 1x1 conv weight, BN1 scale folded in
    # Wt_ref  : (NBC, Kt*NBC)    concat over taps of block-diag temporal weights (BN2 folded)
    # B_ref   : (4, NBC, TV)     [B1 slab, B2 slab, a1 slab, a2 slab]
    NBC, TV = out_ref.shape
    pad = (Kt - 1) // 2

    X = x_ref[...]                                        # (NBC, TV)

    # ---- GCN: folded 1x1 conv + single block-diagonal graph matmul + folded BN1/bias
    H = jnp.dot(Wg_ref[...], X, preferred_element_type=jnp.float32)     # (NBC, TV)
    G = jnp.dot(H, Abd_ref[...], preferred_element_type=jnp.float32) + B_ref[0]
    G = jnp.where(G >= 0.0, G, G * B_ref[2])              # PReLU #1

    # ---- TCN: Kt temporally shifted slabs (roll + iota mask, zero padding at the
    #      time edges) stacked along sublanes -> ONE fused MXU matmul.
    lane = lax.broadcasted_iota(jnp.int32, (NBC, TV), 1)
    slabs = []
    for k in range(Kt):
        s = (pad - k) * V                                 # lane shift for this tap
        if s == 0:
            Sk = G
        else:
            Sk = pltpu.roll(G, shift=s % TV, axis=1)      # circular lane shift (XLU)
            if s > 0:                                     # zero-fill wrapped lanes
                Sk = jnp.where(lane >= s, Sk, 0.0)
            else:
                Sk = jnp.where(lane < TV + s, Sk, 0.0)
        slabs.append(Sk)
    S = jnp.concatenate(slabs, axis=0)                    # (Kt*NBC, TV)

    acc = jnp.dot(Wt_ref[...], S, preferred_element_type=jnp.float32) + B_ref[1]
    acc = acc + X                                         # identity residual
    acc = jnp.where(acc >= 0.0, acc, acc * B_ref[3])      # final PReLU
    out_ref[...] = acc.astype(out_ref.dtype)
    # TODO(synk): Dropout is identity (p=0 / eval); BatchNorm uses folded running
    # statistics (eval mode), not batch statistics.


def _pick_nb(N, C):
    """How many batch elements to fold into the sublane axis per grid step."""
    if N * C <= 512:          # full fold -> single grid step (best on 1-TC chips)
        return N
    best = 1
    for d in range(1, N):
        if N % d == 0 and d * C <= 512 and (d * C) % 8 == 0:
            best = d
    return best


def prepare_st_gcn(A, params, *, C, T, V, Kt, nb):
    """Build all grid-invariant operands once (hoisted out of the per-call path)."""
    (Wg, bg, s1, t1, a1, Wt, bt, s2, t2, a2) = params
    TV = T * V
    A = A.astype(jnp.float32)

    # block-diagonal adjacency: Abd[t*V + v, t*V + w] = A[t, v, w]
    Abd = (jnp.eye(T, dtype=jnp.float32)[:, None, :, None]
           * A[:, :, None, :]).reshape(TV, TV)

    # Fold BN1 scale into the 1x1 conv weight; fold (conv bias -> graph mix -> BN1
    # shift) into a (C, TV) bias slab.  bg commutes through the Abd matmul as
    # bg * colsum(Abd).
    Wg_f = (s1[:, None] * Wg).astype(jnp.float32)                   # (C, C)
    colsum = Abd.sum(axis=0)                                        # (TV,)
    B1 = (s1 * bg)[:, None] * colsum[None, :] + t1[:, None]         # (C, TV)

    # Fold BN2 scale into temporal conv weights; fold (conv bias + BN2 shift).
    Wt_f = (s2[None, :, None] * Wt).astype(jnp.float32)             # (Kt, C, C)
    B2 = jnp.broadcast_to((s2 * bt + t2)[:, None], (C, TV))         # (C, TV)

    # Block-diagonalize over the batch fold and fuse the Kt taps along columns.
    eye_nb = jnp.eye(nb, dtype=jnp.float32)
    Wg_bd = jnp.kron(eye_nb, Wg_f)                                  # (nb*C, nb*C)
    Wt_cat = jnp.concatenate(
        [jnp.kron(eye_nb, Wt_f[k]) for k in range(Kt)], axis=1)     # (nb*C, Kt*nb*C)

    NBC = nb * C
    a1s = jnp.full((NBC, TV), a1, jnp.float32)
    a2s = jnp.full((NBC, TV), a2, jnp.float32)
    Bpack = jnp.stack(
        [jnp.tile(B1, (nb, 1)), jnp.tile(B2, (nb, 1)), a1s, a2s], axis=0
    ).astype(jnp.float32)                                           # (4, nb*C, TV)

    return Abd, Wg_bd, Wt_cat, Bpack


def st_gcn_apply(xf, prepared, *, N, C, T, V, Kt, nb):
    Abd, Wg_bd, Wt_cat, Bpack = prepared
    TV = T * V
    NBC = nb * C
    kernel = functools.partial(_st_gcn_kernel, V=V, Kt=Kt)

    return pl.pallas_call(
        kernel,
        out_shape=jax.ShapeDtypeStruct((N * C, TV), jnp.float32),
        grid_spec=pltpu.PrefetchScalarGridSpec(
            num_scalar_prefetch=0,
            grid=(N // nb,),
            in_specs=[
                pl.BlockSpec((NBC, TV), lambda i: (i, 0)),          # folded x
                pl.BlockSpec((TV, TV), lambda i: (0, 0)),           # block-diag A
                pl.BlockSpec((NBC, NBC), lambda i: (0, 0)),         # folded Wg
                pl.BlockSpec((NBC, Kt * NBC), lambda i: (0, 0)),    # fused folded Wt
                pl.BlockSpec((4, NBC, TV), lambda i: (0, 0, 0)),    # bias/slope slabs
            ],
            out_specs=pl.BlockSpec((NBC, TV), lambda i: (i, 0)),
        ),
        compiler_params=pltpu.CompilerParams(dimension_semantics=("parallel",)),
    )(xf, Abd, Wg_bd, Wt_cat, Bpack)


def st_gcn_forward(x, A, params):
    """x: (N, C, T, V) float32, A: (T, V, V) float32. Returns (out, A)."""
    N, C, T, V = x.shape
    Wt = params[5]
    Kt = Wt.shape[0]
    assert Kt % 2 == 1, "temporal kernel size must be odd (matches PyTorch st_gcn assert)"

    nb = _pick_nb(N, C)
    prepared = prepare_st_gcn(A, params, C=C, T=T, V=V, Kt=Kt, nb=nb)
    xf = x.reshape(N * C, T * V).astype(jnp.float32)
    out = st_gcn_apply(xf, prepared, N=N, C=C, T=T, V=V, Kt=Kt, nb=nb)
    return out.reshape(N, C, T, V), A


def st_gcn_reference(x, A, params):
    """Pure-JAX reference mirroring the PyTorch forward (eval mode)."""
    (Wg, bg, s1, t1, a1, Wt, bt, s2, t2, a2) = params
    N, C, T, V = x.shape
    Kt = Wt.shape[0]
    pad = (Kt - 1) // 2
    bc = lambda v: v.reshape(1, -1, 1, 1)

    y = jnp.einsum('dc,nctv->ndtv', Wg, x) + bc(bg)          # 1x1 conv
    y = jnp.einsum('nctv,tvw->nctw', y, A)                   # graph conv
    y = y * bc(s1) + bc(t1)                                  # BN1 (eval)
    y = jnp.where(y >= 0.0, y, a1 * y)                       # PReLU
    yp = jnp.pad(y, ((0, 0), (0, 0), (pad, pad), (0, 0)))
    h = bc(bt)
    for k in range(Kt):                                      # temporal conv (Kt,1)
        h = h + jnp.einsum('dc,nctv->ndtv', Wt[k], yp[:, :, k:k + T, :])
    h = h * bc(s2) + bc(t2)                                  # BN2 (eval)
    h = h + x                                                # residual (identity)
    h = jnp.where(h >= 0.0, h, a2 * h)                       # final PReLU
    return h


def make_params(key, C, Kt):
    ks = jax.random.split(key, 8)
    eps = 1e-5
    # gcn 1x1 conv
    Wg = jax.random.normal(ks[0], (C, C), jnp.float32) * 0.3
    bg = jax.random.normal(ks[1], (C,), jnp.float32) * 0.1
    # BatchNorm #1 (folded: scale = gamma/sqrt(var+eps), shift = beta - mean*scale)
    g1 = 1.0 + 0.1 * jax.random.normal(ks[2], (C,), jnp.float32)
    b1 = 0.1 * jax.random.normal(ks[3], (C,), jnp.float32)
    m1 = jnp.zeros((C,), jnp.float32)
    v1 = jnp.ones((C,), jnp.float32)
    s1 = g1 / jnp.sqrt(v1 + eps)
    t1 = b1 - m1 * s1
    a1 = jnp.float32(0.25)                                   # PReLU default slope
    # temporal conv (Kt, out_ch, in_ch)
    Wt = jax.random.normal(ks[4], (Kt, C, C), jnp.float32) * 0.2
    bt = jax.random.normal(ks[5], (C,), jnp.float32) * 0.1
    # BatchNorm #2
    g2 = 1.0 + 0.1 * jax.random.normal(ks[6], (C,), jnp.float32)
    b2 = 0.1 * jax.random.normal(ks[7], (C,), jnp.float32)
    s2 = g2 / jnp.sqrt(jnp.ones((C,), jnp.float32) + eps)
    t2 = b2
    a2 = jnp.float32(0.25)
    return (Wg, bg, s1, t1, a1, Wt, bt, s2, t2, a2)


if __name__ == "__main__":
    # Small shapes: N=2, C_in=C_out=4, T=8 time steps, V=16 graph nodes,
    # kernel_size = (3, T) -> temporal taps Kt=3, graph kernel K == T == A.shape[0].
    # T*V = 128 lanes; N*C = 8 sublanes -> the whole problem is one (8,128) vreg slab.
    N, C, T, V, Kt = 2, 4, 8, 16, 3
    key = jax.random.PRNGKey(0)
    kx, kA, kp = jax.random.split(key, 3)

    x = jax.random.normal(kx, (N, C, T, V), jnp.float32)
    A = jax.random.normal(kA, (T, V, V), jnp.float32) * 0.2
    params = make_params(kp, C, Kt)

    out, A_out = st_gcn_forward(x, A, params)
    out = jax.block_until_ready(out)

    ref = st_gcn_reference(x, A, params)
    assert out.shape == (N, C, T, V)
    assert jnp.allclose(out, ref, atol=1e-4, rtol=1e-4), "mismatch vs JAX reference"
    assert jnp.array_equal(A_out, A)

    print("KERNEL_OK")
</pallas_src>

<mosaic_0001>
module attributes {stable_mosaic.version = 11 : i64} {
  func.func @_st_gcn_kernel(%arg0: i32, %arg1: memref<8x128xf32, #tpu.memory_space<vmem>>, %arg2: memref<128x128xf32, #tpu.memory_space<vmem>>, %arg3: memref<8x8xf32, #tpu.memory_space<vmem>>, %arg4: memref<8x24xf32, #tpu.memory_space<vmem>>, %arg5: memref<4x8x128xf32, #tpu.memory_space<vmem>>, %arg6: memref<8x128xf32, #tpu.memory_space<vmem>>) attributes {dimension_semantics = [#tpu.dimension_semantics<parallel>], iteration_bounds = array<i64: 1>, scalar_prefetch = 0 : i64, scratch_operands = 0 : i64, tpu.core_type = #tpu.core_type<tc>, window_params = [{transform_indices = @transform_0, window_bounds = array<i64: 8, 128>}, {pipeline_mode = #tpu.pipeline_mode<synchronous>, transform_indices = @transform_1, window_bounds = array<i64: 128, 128>}, {pipeline_mode = #tpu.pipeline_mode<synchronous>, transform_indices = @transform_2, window_bounds = array<i64: 8, 8>}, {pipeline_mode = #tpu.pipeline_mode<synchronous>, transform_indices = @transform_3, window_bounds = array<i64: 8, 24>}, {pipeline_mode = #tpu.pipeline_mode<synchronous>, transform_indices = @transform_4, window_bounds = array<i64: 4, 8, 128>}, {transform_indices = @transform_5, window_bounds = array<i64: 8, 128>}]} {
    %c0 = arith.constant 0 : index
    %c0_0 = arith.constant 0 : index
    %0 = vector.load %arg1[%c0, %c0_0] : memref<8x128xf32, #tpu.memory_space<vmem>>, vector<8x128xf32>
    %c0_1 = arith.constant 0 : index
    %c0_2 = arith.constant 0 : index
    %1 = vector.load %arg3[%c0_1, %c0_2] : memref<8x8xf32, #tpu.memory_space<vmem>>, vector<8x8xf32>
    %cst = arith.constant dense<0.000000e+00> : vector<8x128xf32>
    %2 = tpu.matmul %1, %0, %cst {dimension_numbers = #tpu.dot_dimension_numbers<[1], [0], [0], [1], [0, 0, 1, 1], [], []>} : vector<8x8xf32>, vector<8x128xf32>, vector<8x128xf32> -> vector<8x128xf32>
    %c0_3 = arith.constant 0 : index
    %c0_4 = arith.constant 0 : index
    %3 = vector.load %arg2[%c0_3, %c0_4] : memref<128x128xf32, #tpu.memory_space<vmem>>, vector<128x128xf32>
    %cst_5 = arith.constant dense<0.000000e+00> : vector<8x128xf32>
    %4 = tpu.matmul %2, %3, %cst_5 {dimension_numbers = #tpu.dot_dimension_numbers<[1], [0], [0], [1], [0, 0, 1, 1], [], []>} : vector<8x128xf32>, vector<128x128xf32>, vector<8x128xf32> -> vector<8x128xf32>
    %c0_6 = arith.constant 0 : index
    %c0_7 = arith.constant 0 : index
    %c0_8 = arith.constant 0 : index
    %5 = vector.load %arg5[%c0_6, %c0_7, %c0_8] : memref<4x8x128xf32, #tpu.memory_space<vmem>>, vector<1x8x128xf32>
    %6 = vector.shape_cast %5 : vector<1x8x128xf32> to vector<8x128xf32>
    %7 = arith.addf %4, %6 : vector<8x128xf32>
    %cst_9 = arith.constant 0.000000e+00 : f32
    %8 = vector.broadcast %cst_9 : f32 to vector<8x128xf32>
    %9 = arith.cmpf oge, %7, %8 : vector<8x128xf32>
    %c2 = arith.constant 2 : index
    %c0_10 = arith.constant 0 : index
    %c0_11 = arith.constant 0 : index
    %10 = vector.load %arg5[%c2, %c0_10, %c0_11] : memref<4x8x128xf32, #tpu.memory_space<vmem>>, vector<1x8x128xf32>
    %11 = vector.shape_cast %10 : vector<1x8x128xf32> to vector<8x128xf32>
    %12 = arith.mulf %7, %11 : vector<8x128xf32>
    %13 = arith.select %9, %7, %12 : vector<8x128xi1>, vector<8x128xf32>
    %14 = tpu.iota {dimensions = array<i32: 1>} : vector<8x128xi32>
    %c16_i32 = arith.constant 16 : i32
    %15 = tpu.dynamic_rotate %13 by %c16_i32 dim 1 : vector<8x128xf32>, i32 -> vector<8x128xf32>
    %c16_i32_12 = arith.constant 16 : i32
    %16 = vector.broadcast %c16_i32_12 : i32 to vector<8x128xi32>
    %17 = arith.cmpi sge, %14, %16 : vector<8x128xi32>
    %cst_13 = arith.constant 0.000000e+00 : f32
    %18 = vector.broadcast %cst_13 : f32 to vector<8x128xf32>
    %19 = arith.select %17, %15, %18 : vector<8x128xi1>, vector<8x128xf32>
    %c112_i32 = arith.constant 112 : i32
    %20 = tpu.dynamic_rotate %13 by %c112_i32 dim 1 : vector<8x128xf32>, i32 -> vector<8x128xf32>
    %c112_i32_14 = arith.constant 112 : i32
    %21 = vector.broadcast %c112_i32_14 : i32 to vector<8x128xi32>
    %22 = arith.cmpi slt, %14, %21 : vector<8x128xi32>
    %cst_15 = arith.constant 0.000000e+00 : f32
    %23 = vector.broadcast %cst_15 : f32 to vector<8x128xf32>
    %24 = arith.select %22, %20, %23 : vector<8x128xi1>, vector<8x128xf32>
    %25 = tpu.concatenate %19, %13, %24 in 0 : vector<8x128xf32>, vector<8x128xf32>, vector<8x128xf32> -> vector<24x128xf32>
    %c0_16 = arith.constant 0 : index
    %c0_17 = arith.constant 0 : index
    %26 = vector.load %arg4[%c0_16, %c0_17] : memref<8x24xf32, #tpu.memory_space<vmem>>, vector<8x24xf32>
    %cst_18 = arith.constant dense<0.000000e+00> : vector<8x128xf32>
    %27 = tpu.matmul %26, %25, %cst_18 {dimension_numbers = #tpu.dot_dimension_numbers<[1], [0], [0], [1], [0, 0, 1, 1], [], []>} : vector<8x24xf32>, vector<24x128xf32>, vector<8x128xf32> -> vector<8x128xf32>
    %c1 = arith.constant 1 : index
    %c0_19 = arith.constant 0 : index
    %c0_20 = arith.constant 0 : index
    %28 = vector.load %arg5[%c1, %c0_19, %c0_20] : memref<4x8x128xf32, #tpu.memory_space<vmem>>, vector<1x8x128xf32>
    %29 = vector.shape_cast %28 : vector<1x8x128xf32> to vector<8x128xf32>
    %30 = arith.addf %27, %29 : vector<8x128xf32>
    %31 = arith.addf %30, %0 : vector<8x128xf32>
    %cst_21 = arith.constant 0.000000e+00 : f32
    %32 = vector.broadcast %cst_21 : f32 to vector<8x128xf32>
    %33 = arith.cmpf oge, %31, %32 : vector<8x128xf32>
    %c3 = arith.constant 3 : index
    %c0_22 = arith.constant 0 : index
    %c0_23 = arith.constant 0 : index
    %34 = vector.load %arg5[%c3, %c0_22, %c0_23] : memref<4x8x128xf32, #tpu.memory_space<vmem>>, vector<1x8x128xf32>
    %35 = vector.shape_cast %34 : vector<1x8x128xf32> to vector<8x128xf32>
    %36 = arith.mulf %31, %35 : vector<8x128xf32>
    %37 = arith.select %33, %31, %36 : vector<8x128xi1>, vector<8x128xf32>
    %c0_24 = arith.constant 0 : index
    %c0_25 = arith.constant 0 : index
    %38 = vector.load %arg6[%c0_24, %c0_25] : memref<8x128xf32, #tpu.memory_space<vmem>>, vector<8x128xf32>
    tpu.vector_store %arg6[%c0_24, %c0_25], %37 {strides = array<i32>} : memref<8x128xf32, #tpu.memory_space<vmem>>, vector<8x128xf32>,
    return
  }
  func.func @transform_0(%arg0: i32) -> (i32, i32) {
    %c0_i32 = arith.constant 0 : i32
    %c0_i32_0 = arith.constant 0 : i32
    return %arg0, %c0_i32 : i32, i32
  }
  func.func @transform_1(%arg0: i32) -> (i32, i32) {
    %c0_i32 = arith.constant 0 : i32
    %c0_i32_0 = arith.constant 0 : i32
    %c0_i32_1 = arith.constant 0 : i32
    return %c0_i32, %c0_i32_0 : i32, i32
  }
  func.func @transform_2(%arg0: i32) -> (i32, i32) {
    %c0_i32 = arith.constant 0 : i32
    %c0_i32_0 = arith.constant 0 : i32
    %c0_i32_1 = arith.constant 0 : i32
    return %c0_i32, %c0_i32_0 : i32, i32
  }
  func.func @transform_3(%arg0: i32) -> (i32, i32) {
    %c0_i32 = arith.constant 0 : i32
    %c0_i32_0 = arith.constant 0 : i32
    %c0_i32_1 = arith.constant 0 : i32
    return %c0_i32, %c0_i32_0 : i32, i32
  }
  func.func @transform_4(%arg0: i32) -> (i32, i32, i32) {
    %c0_i32 = arith.constant 0 : i32
    %c0_i32_0 = arith.constant 0 : i32
    %c0_i32_1 = arith.constant 0 : i32
    %c0_i32_2 = arith.constant 0 : i32
    return %c0_i32, %c0_i32_0, %c0_i32_1 : i32, i32, i32
  }
  func.func @transform_5(%arg0: i32) -> (i32, i32) {
    %c0_i32 = arith.constant 0 : i32
    %c0_i32_0 = arith.constant 0 : i32
    return %arg0, %c0_i32 : i32, i32
  }
}

</mosaic_0001>

<bundles_post_ra>
// kernel: tpu_custom_call.1
= control target key start
LH: loop header
LB: loop body
LE: loop exit
PB: predicated region body
PF: predicated region fallthrough
CT: control target
= control target key end

     0   :  { %10 = vsyncpa [#allocation3], 0  ;;  %s674_s0 = inlined_call_operand.hbm [shape: f32[8,128], index: 0, kind: input, shape index: {}]   ;;  %s675_s1 = inlined_call_operand.hbm [shape: f32[128,128], index: 1, kind: input, shape index: {}]   ;;  %s676_s2 = inlined_call_operand.hbm [shape: f32[8,8], index: 2, kind: input, shape index: {}]   ;;  %s677_s3 = inlined_call_operand.hbm [shape: f32[8,24], index: 3, kind: input, shape index: {}]   ;;  %s678_s4 = inlined_call_operand.hbm [shape: f32[4,8,128], index: 4, kind: input, shape index: {}]   ;;  %s679_s5 = inlined_call_operand.hbm [shape: f32[8,128], index: 5, kind: output, shape index: {}]  }
   0x1   :  { %11 = vsyncpa [#allocation6], 0 }
   0x2   :  { %12 = vsyncpa [#allocation9], 0 }
   0x3   :  { %13 = vsyncpa [#allocation4], 0  ;;  %s578_s18 = smov [#allocation5]  }
   0x4   :  { %s29_s19 = sshll.u32 %s578_s18, 4  ;;  %s30_s19 = int_to_ptr.vmem [resolvable:$true] %s29_s19 }
   0x5   :  { %s458_s20 = scalar_lea.vmem %s30_s19, 2048  ;;  %p463_p1 = scmp.lt.s32.totalorder %s30_s19, %s30_s19 }
   0x6   :  { %p459_p0 = scmp.ne.s32.totalorder %s30_s19, %s458_s20  ;;  %p464_p2 = scmp.lt.s32.totalorder %s458_s20, %s458_s20 }
   0x8   :  { %p465_p3 = por %p464_p2, %p463_p1 }
   0xa   :  { %p466_p4 = pnand %p465_p3, %p459_p0 }
   0xc   :  { %469 = shalt.err (!%p466_p4)
}
   0xd   :  { %s579_s21 = smov 128   ;;  %s580_s22 = smov 8  }
   0xe   :  { %35 = dma.hbm_to_vmem [thread:$0]  %s675_s1, 2048, %s30_s19, [#allocation6], %s579_s21, %s579_s21, %s580_s22  }
   0xf   :  { %s581_s25 = smov [#allocation8]   ;;  %s582_s27 = smov [#allocation2]  }
  0x10   :  { %s52_s26 = sshll.u32 %s581_s25, 4  ;;  %s20_s28 = sshll.u32 %s582_s27, 4  ;;  %s53_s26 = int_to_ptr.vmem [resolvable:$true] %s52_s26  ;;  %s21_s28 = int_to_ptr.vmem [resolvable:$true] %s20_s28 }
  0x11   :  { %s478_s29 = scalar_lea.vmem %s53_s26, 128  ;;  %p483_p6 = scmp.lt.s32.totalorder %s53_s26, %s53_s26 }
  0x12   :  { %p479_p5 = scmp.ne.s32.totalorder %s53_s26, %s478_s29  ;;  %p484_p7 = scmp.lt.s32.totalorder %s478_s29, %s478_s29 }
  0x14   :  { %p485_p8 = por %p484_p7, %p483_p6 }
  0x16   :  { %p486_p9 = pnand %p485_p8, %p479_p5 }
  0x18   :  { %489 = shalt.err (!%p486_p9)
}
  0x19   :  { %55 = dma.hbm_to_vmem [thread:$0]  %s677_s3, 128, %s53_s26, [#allocation9]  }
  0x1a   :  { %s498_s7 = scalar_lea.vmem %s21_s28, 128  ;;  %p503_p11 = scmp.lt.s32.totalorder %s21_s28, %s21_s28 }
  0x1b   :  { %p499_p10 = scmp.ne.s32.totalorder %s21_s28, %s498_s7  ;;  %p504_p12 = scmp.lt.s32.totalorder %s498_s7, %s498_s7 }
  0x1d   :  { %p505_p13 = por %p504_p12, %p503_p11 }
  0x1f   :  { %p506_p0 = pnand %p505_p13, %p499_p10 }
  0x21   :  { %509 = shalt.err (!%p506_p0)
}
  0x22   :  { %23 = dma.hbm_to_vmem [thread:$0]  %s674_s0, 128, %s21_s28, [#allocation3]  }
  0x23   :  { %s583_s9 = smov [#allocation7]   ;;  %s584_s11 = smov [#allocation10]  }
  0x24   :  { %s42_s10 = sshll.u32 %s583_s9, 4  ;;  %s61_s12 = sshll.u32 %s584_s11, 4  ;;  %s43_s10 = int_to_ptr.vmem [resolvable:$true] %s42_s10  ;;  %s62_s12 = int_to_ptr.vmem [resolvable:$true] %s61_s12 }
  0x25   :  { %s518_s13 = scalar_lea.vmem %s43_s10, 128  ;;  %p523_p2 = scmp.lt.s32.totalorder %s43_s10, %s43_s10 }
  0x26   :  { %p519_p1 = scmp.ne.s32.totalorder %s43_s10, %s518_s13  ;;  %p524_p3 = scmp.lt.s32.totalorder %s518_s13, %s518_s13 }
  0x28   :  { %p525_p4 = por %p524_p3, %p523_p2 }
  0x2a   :  { %p526_p5 = pnand %p525_p4, %p519_p1 }
  0x2c   :  { %529 = shalt.err (!%p526_p5)
}
  0x2d   :  { %45 = dma.hbm_to_vmem [thread:$0]  %s676_s2, 128, %s43_s10, [#allocation6]  }
  0x2e   :  { %s538_s15 = scalar_lea.vmem %s62_s12, 512  ;;  %p543_p7 = scmp.lt.s32.totalorder %s62_s12, %s62_s12 }
  0x2f   :  { %p539_p6 = scmp.ne.s32.totalorder %s62_s12, %s538_s15  ;;  %p544_p8 = scmp.lt.s32.totalorder %s538_s15, %s538_s15 }
  0x31   :  { %p545_p9 = por %p544_p8, %p543_p7 }
  0x33   :  { %p546_p10 = pnand %p545_p9, %p539_p6 }
  0x35   :  { %549 = shalt.err (!%p546_p10)
}
  0x36   :  { %67 = dma.hbm_to_vmem [thread:$0]  %s678_s4, 512, %s62_s12, [#allocation9], %s579_s21, %s579_s21, %s580_s22  }
  0x37   :  { %570 = dma.done.wait [#allocation3], 128  }
  0x38   :  { %571 = vsyncadd [#allocation3], 4294967168 }
  0x39   :  { %572 = dma.done.wait [#allocation6], 2176  }
  0x3a   :  { %573 = vsyncadd [#allocation6], 4294965120 }
  0x3b   :  { %574 = dma.done.wait [#allocation9], 640  }
  0x3c   :  { %575 = vsyncadd [#allocation9], 4294966656  ;;  %v585_v0 = vmov 0.0   ;;  %vm586_vm0 = vmmov 0   ;;  %vm85_vm1 = vcmask 64512   ;;  %v647_v1 = vld [vmem:[#allocation2] sm:$0xff]  ;;  %v251_v28 = vlaneseq }
  0x3d   :  { %389 = vmatprep.subr.mxu0 %v585_v0  ;;  %391 = vmatprep.mubr.msk.f32.mxu0 %vm586_vm0, %v585_v0  ;;  %v84_v2 = vld [vmem:[#allocation7] sm:$0xff]  ;;  %v174_v3 = vld [vmem:[#allocation5 + $0x78] sm:$0xff]  ;;  %v173_v4 = vld [vmem:[#allocation5 + $0x70] sm:$0xff]  ;;  %s587_s2 = smov 112   ;;  %s588_s4 = smov 16   ;;  %vm264_vm5 = vcmask 195584  }
  0x3e   :  { %394 = vmatprep.subr.mxu1 %v585_v0  ;;  %426 = vmatprep.mubr.msk.f32.mxu1 %vm586_vm0, %v585_v0  ;;  %v172_v5 = vld [vmem:[#allocation5 + $0x68] sm:$0xff]  ;;  %v171_v6 = vld [vmem:[#allocation5 + $0x60] sm:$0xff]  ;;  %v170_v7 = vld [vmem:[#allocation5 + $0x58] sm:$0xff]  ;;  %v252_v29 = vand.u32 127, %v251_v28  ;;  %s589_s17 = smov [#allocation11]  }
  0x3f   :  { %390 = vmatpush3.msra.mxu0 %v647_v1  ;;  %395 = vmatpush3.msra.mxu1 %v174_v3  ;;  %v169_v8 = vld [vmem:[#allocation5 + $0x50] sm:$0xff]  ;;  %v168_v9 = vld [vmem:[#allocation5 + $0x48] sm:$0xff]  ;;  %v167_v10 = vld [vmem:[#allocation5 + $0x40] sm:$0xff]  ;;  %s351_s18 = sshll.u32 %s589_s17, 4  ;;  %s352_s18 = int_to_ptr.vmem [resolvable:$true] %s351_s18 }
  0x40   :  { %392 = vmatmul.mubr.msk.f32.vlgmr.msra.gmra.mxu0 %vm85_vm1, %v84_v2  ;;  %396 = vmatprep.subr.mxu1 %v585_v0  ;;  %v166_v11 = vld [vmem:[#allocation5 + $0x38] sm:$0xff]  ;;  %v165_v12 = vld [vmem:[#allocation5 + $0x30] sm:$0xff]  ;;  %v164_v13 = vld [vmem:[#allocation5 + $0x28] sm:$0xff]  ;;  %vm259_vm3 = vcmp.lt.s32.totalorder %v252_v29, 112  ;;  %vm255_vm4 = vcmp.ge.s32.totalorder %v252_v29, 16  ;;  %s550_s19 = scalar_lea.vmem %s352_s18, 128  ;;  %p555_p12 = scmp.lt.s32.totalorder %s352_s18, %s352_s18 }
  0x41   :  { %397 = vmatpush3.msra.mxu1 %v173_v4  ;;  %429 = vmatprep.subr.mxu0 %v585_v0  ;;  %v163_v14 = vld [vmem:[#allocation5 + $0x20] sm:$0xff]  ;;  %v162_v15 = vld [vmem:[#allocation5 + $0x18] sm:$0xff]  ;;  %v161_v16 = vld [vmem:[#allocation5 + $0x10] sm:$0xff]  ;;  %p551_p11 = scmp.ne.s32.totalorder %s352_s18, %s550_s19  ;;  %p556_p13 = scmp.lt.s32.totalorder %s550_s19, %s550_s19 }
  0x42   :  { %398 = vmatprep.subr.mxu1 %v585_v0  ;;  %435 = vmatprep.mubr.msk.f32.mxu0 %vm586_vm0, %v585_v0  ;;  %v160_v17 = vld [vmem:[#allocation5 + $0x8] sm:$0xff]  ;;  %v159_v18 = vld [vmem:[#allocation5] sm:$0xff]  ;;  %v175_v21 = vld [vmem:[#allocation10] sm:$0xff] }
  0x43   :  { %399 = vmatpush3.msra.mxu1 %v172_v5  ;;  %v248_v23 = vld [vmem:[#allocation10 + $0x10] sm:$0xff]  ;;  %v261_v31 = vld [vmem:[#allocation8] sm:$0xff]  ;;  %v263_v33 = vld [vmem:[#allocation10 + $0x8] sm:$0xff]  ;;  %p557_p0 = por %p556_p13, %p555_p12 }
  0x44   :  { %400 = vmatprep.subr.mxu1 %v585_v0  ;;  %v341_v36 = vld [vmem:[#allocation10 + $0x18] sm:$0xff] }
  0x45   :  { %401 = vmatpush3.msra.mxu1 %v171_v6  ;;  %p558_p1 = pnand %p557_p0, %p551_p11 }
  0x46   :  { %402 = vmatprep.subr.mxu1 %v585_v0 }
  0x47   :  { %403 = vmatpush3.msra.mxu1 %v170_v7 }
  0x48   :  { %404 = vmatprep.subr.mxu1 %v585_v0 }
  0x49   :  { %405 = vmatpush3.msra.mxu1 %v169_v8 }
  0x4a   :  { %406 = vmatprep.subr.mxu1 %v585_v0 }
  0x4b   :  { %407 = vmatpush3.msra.mxu1 %v168_v9 }
  0x4c   :  { %408 = vmatprep.subr.mxu1 %v585_v0 }
  0x4d   :  { %409 = vmatpush3.msra.mxu1 %v167_v10 }
  0x4e   :  { %410 = vmatprep.subr.mxu1 %v585_v0 }
  0x4f   :  { %411 = vmatpush3.msra.mxu1 %v166_v11 }
  0x50   :  { %412 = vmatprep.subr.mxu1 %v585_v0 }
  0x51   :  { %413 = vmatpush3.msra.mxu1 %v165_v12 }
  0x52   :  { %414 = vmatprep.subr.mxu1 %v585_v0 }
  0x53   :  { %415 = vmatpush3.msra.mxu1 %v164_v13 }
  0x54   :  { %416 = vmatprep.subr.mxu1 %v585_v0 }
  0x55   :  { %417 = vmatpush3.msra.mxu1 %v163_v14 }
  0x56   :  { %418 = vmatprep.subr.mxu1 %v585_v0 }
  0x57   :  { %419 = vmatpush3.msra.mxu1 %v162_v15 }
  0x58   :  { %420 = vmatprep.subr.mxu1 %v585_v0 }
  0x59   :  { %421 = vmatpush3.msra.mxu1 %v161_v16 }
  0x5a   :  { %422 = vmatprep.subr.mxu1 %v585_v0 }
  0x5b   :  { %423 = vmatpush3.msra.mxu1 %v160_v17 }
  0x5c   :  { %424 = vmatprep.subr.mxu1 %v585_v0 }
  0x5d   :  { %425 = vmatpush3.msra.mxu1 %v159_v18 }
 0x100   :  { %v155_v19 = vpop.f32.mrf.mxu0 }
 0x101   :  { %427 = vmatmul.mubr.f32.vlgmr.msra.gmra.mxu1 %v155_v19 }
 0x102   :  { %v393_v20 = vpop.f32.mrf.mxu0 }
 0x1c1   :  { %v242_v22 = vpop.f32.mrf.mxu1 }
 0x1c2   :  { %v243_v24 = vadd.f32 %v242_v22, %v175_v21 }
 0x1c3   :  { %v428_v25 = vpop.f32.mrf.mxu1 }
 0x1c4   :  { %v249_v26 = vmul.f32 %v248_v23, %v243_v24  ;;  %vm246_vm2 = vcmp.ge.f32.partialorder %v243_v24, 0.0 }
 0x1c6   :  { %v250_v27 = vsel %vm246_vm2, %v243_v24, %v249_v26 }
 0x1c7   :  { %257 = vrot.lane.b32.xlu0 %v250_v27, %s587_s2 }
 0x1cb   :  { %253 = vrot.lane.b32.xlu0 %v250_v27, %s588_s4 }
 0x239   :  { %v258_v30 = vpop.permute.xlu0 %257 }
 0x23a   :  { %430 = vmatpush3.msk.msra.mxu0 %vm259_vm3, %v258_v30 }
 0x23b   :  { %431 = vmatprep.subr.mxu0 %v585_v0 }
 0x23c   :  { %432 = vmatpush3.msra.mxu0 %v250_v27 }
 0x23d   :  { %433 = vmatprep.subr.mxu0 %v585_v0  ;;  %v254_v32 = vpop.permute.xlu0 %253 }
 0x23e   :  { %434 = vmatpush3.msk.msra.mxu0 %vm255_vm4, %v254_v32 }
 0x23f   :  { %436 = vmatmul.mubr.msk.f32.vlgmr.msra.gmra.mxu0 %vm264_vm5, %v261_v31 }
 0x2ff   :  { %v334_v34 = vpop.f32.mrf.mxu0 }
 0x300   :  { %v335_v35 = vadd.f32 %v334_v34, %v263_v33 }
 0x301   :  { %v437_v37 = vpop.f32.mrf.mxu0 }
 0x302   :  { %v338_v38 = vadd.f32 %v335_v35, %v647_v1 }
 0x304   :  { %v342_v39 = vmul.f32 %v341_v36, %v338_v38  ;;  %vm339_vm6 = vcmp.ge.f32.partialorder %v338_v38, 0.0 }
 0x306   :  { %v343_v40 = vsel %vm339_vm6, %v338_v38, %v342_v39 }
 0x307   :  { %344 = vst [vmem:[#allocation11] sm:$0xff] %v343_v40 }
 0x308   :  { %561 = shalt.err (!%p558_p1)
}
 0x309   :  { %354 = dma.vmem_to_hbm [thread:$0]  %s352_s18, 128, %s679_s5, [#allocation4]  }
 0x30a   :  { %576 = dma.done.wait [#allocation4], 128  }
 0x30b   :  { %577 = vsyncadd [#allocation4], 4294967168 }
 0x30c   :  { %358 = vsyncpa [#allocation3], 1 }
 0x30d   :  { %359 = vsyncpa [#allocation6], 1 }
 0x30e   :  { %360 = vsyncpa [#allocation9], 1 }
 0x30f   :  { %361 = vsyncpa [#allocation4], 1 }

</bundles_post_ra>
